<compile_context>
chip_gen: v7x
topology: tpu7x:2x2x1
jax: 0.10.0
libtpu: 0.0.40
codegen_flags: <defaults>
</compile_context>

<pallas_src>
import jax
import jax.numpy as jnp
from jax.experimental import pallas as pl
from jax.experimental.pallas import tpu as pltpu


LANE = 128
# ~4 MiB per array per block (dtype-aware row count derived below).
TILE_BYTES = 4 * 1024 * 1024
# 3 arrays x 2 buffers x 4 MiB = 24 MiB < 32 MiB; 32 MiB <= physical VMEM on
# v5e (128 MiB), v6e (128 MiB) and v7x (64 MiB per TC).
VMEM_LIMIT_BYTES = 32 * 1024 * 1024


def _round_up(x, m):
    return (x + m - 1) // m * m


def _min_sublane(itemsize):
    # Packed-tile minimum second-minor dim: (8,128) f32, (16,128) bf16, (32,128) int8.
    return {4: 8, 2: 16, 1: 32}.get(itemsize, 8)


def _choose_tile_rows(rows, itemsize):
    min_sub = _min_sublane(itemsize)
    if rows <= min_sub:
        # Single tiny block equal to the full dim (allowed even when not a
        # multiple of the sublane minimum).
        return rows
    # Largest block keeping ~TILE_BYTES per array, rounded to the dtype's
    # sublane minimum.
    max_rows = max(min_sub, (TILE_BYTES // (LANE * itemsize)) // min_sub * min_sub)
    # Aim for >= 2 grid steps so both v7x TensorCores get work on mid-size
    # tensors; costs at most one extra ~0.35us step on single-TC chips.
    target = _round_up(pl.cdiv(rows, 2), min_sub)
    return min(max_rows, target)


def _madc_kernel(gamma_ref, origin_ref, t2_ref, out_ref):
    # gamma_ref: SMEM f32 scalar (shape (1,)); origin/t2/out: VMEM tiles.
    # Compute in f32 (matches the PyTorch f32 parameter), cast only on store.
    g = gamma_ref[0]
    out_ref[...] = (
        t2_ref[...].astype(jnp.float32) * g + origin_ref[...].astype(jnp.float32)
    ).astype(out_ref.dtype)


def _madc_tiled_2d(gamma_f32, origin_2d, t2_2d):
    """Fused out = t2 * gamma + origin over a lane-dense (rows, 128) slab."""
    rows, lane = origin_2d.shape
    dtype = origin_2d.dtype
    itemsize = jnp.dtype(dtype).itemsize

    tile_rows = _choose_tile_rows(rows, itemsize)
    grid = (pl.cdiv(rows, tile_rows),)

    cost = pl.CostEstimate(
        flops=2 * rows * lane,
        transcendentals=0,
        bytes_accessed=3 * rows * lane * itemsize,
    )

    return pl.pallas_call(
        _madc_kernel,
        out_shape=jax.ShapeDtypeStruct((rows, lane), dtype),
        grid_spec=pltpu.PrefetchScalarGridSpec(
            num_scalar_prefetch=0,
            grid=grid,
            in_specs=[
                pl.BlockSpec(memory_space=pltpu.SMEM),              # gamma (1,)
                pl.BlockSpec((tile_rows, lane), lambda i: (i, 0)),  # origin
                pl.BlockSpec((tile_rows, lane), lambda i: (i, 0)),  # t2
            ],
            out_specs=pl.BlockSpec((tile_rows, lane), lambda i: (i, 0)),
        ),
        compiler_params=pltpu.CompilerParams(
            # "parallel" lets v7x shard the grid across its two TensorCores;
            # no-op on single-TC v5e/v6e.
            dimension_semantics=("parallel",),
            vmem_limit_bytes=VMEM_LIMIT_BYTES,
        ),
        cost_estimate=cost,
    )(gamma_f32, origin_2d, t2_2d)


def multiply_add_channels_one_weight(origin, t2, gamma):
    """out = t2 * gamma + origin, elementwise. origin/t2 same shape (NCHW)."""
    assert origin.shape == t2.shape
    orig_shape = origin.shape
    n = origin.size

    gamma_f32 = jnp.asarray(gamma, dtype=jnp.float32).reshape(1)

    if n % LANE == 0:
        # Common case: pure (free) reshapes around the Pallas call.
        rows = n // LANE
        out = _madc_tiled_2d(
            gamma_f32, origin.reshape(rows, LANE), t2.reshape(rows, LANE)
        )
        return out.reshape(orig_shape)

    # Ragged size (not a multiple of 128): run the 128-aligned prefix through
    # the kernel (no full-array pad copies) and compute the <128-element tail
    # with plain jnp, then re-pack the output.
    o_flat = origin.reshape(-1)
    t_flat = t2.reshape(-1)
    n_aligned = (n // LANE) * LANE
    tail_out = (
        t_flat[n_aligned:].astype(jnp.float32) * gamma_f32[0]
        + o_flat[n_aligned:].astype(jnp.float32)
    ).astype(origin.dtype)
    if n_aligned == 0:
        return tail_out.reshape(orig_shape)
    rows = n_aligned // LANE
    head_out = _madc_tiled_2d(
        gamma_f32,
        o_flat[:n_aligned].reshape(rows, LANE),
        t_flat[:n_aligned].reshape(rows, LANE),
    )
    return jnp.concatenate([head_out.reshape(-1), tail_out]).reshape(orig_shape)


class MultiplyAddChannelsOneWeight:
    """JAX/Pallas port of the PyTorch module. gamma initialized to 0 (as in __init__)."""

    def __init__(self):
        # torch.nn.Parameter(torch.zeros(1)) -> kept in float32 like PyTorch.
        self.gamma = jnp.zeros((1,), dtype=jnp.float32)

    def __call__(self, inputs):
        if len(inputs) != 2:
            raise Exception(
                "An multiplyAddChannelsOneWeight layer should have 2 inputs"
            )
        origin, t2 = inputs
        return multiply_add_channels_one_weight(origin, t2, self.gamma)


if __name__ == "__main__":
    key = jax.random.PRNGKey(0)
    k1, k2, k3, k4, k5, k6 = jax.random.split(key, 6)

    mod = MultiplyAddChannelsOneWeight()
    # use a nonzero gamma so the multiply path is actually exercised
    mod.gamma = jnp.array([0.5], dtype=jnp.float32)

    # --- test 1: NCHW f32, size multiple of 128 (aligned path, 2 grid blocks) ---
    origin = jax.random.normal(k1, (2, 4, 16, 16), dtype=jnp.float32)
    t2 = jax.random.normal(k2, (2, 4, 16, 16), dtype=jnp.float32)
    out = mod([origin, t2])
    jax.block_until_ready(out)
    ref = t2 * mod.gamma[0] + origin
    assert out.shape == origin.shape
    assert jnp.allclose(out, ref, atol=1e-6, rtol=1e-6)

    # --- test 2: ragged size (not a multiple of 128) -> prefix + tail path ---
    origin_r = jax.random.normal(k3, (2, 3, 5, 7), dtype=jnp.float32)
    t2_r = jax.random.normal(k4, (2, 3, 5, 7), dtype=jnp.float32)
    out_r = mod([origin_r, t2_r])
    jax.block_until_ready(out_r)
    ref_r = t2_r * mod.gamma[0] + origin_r
    assert out_r.shape == origin_r.shape
    assert jnp.allclose(out_r, ref_r, atol=1e-6, rtol=1e-6)

    # --- test 3: bf16 inputs exercise the dtype-aware (16,128) tiling ---
    origin_b = jax.random.normal(k5, (2, 4, 16, 16), dtype=jnp.bfloat16)
    t2_b = jax.random.normal(k6, (2, 4, 16, 16), dtype=jnp.bfloat16)
    out_b = mod([origin_b, t2_b])
    jax.block_until_ready(out_b)
    ref_b = (
        t2_b.astype(jnp.float32) * mod.gamma[0] + origin_b.astype(jnp.float32)
    ).astype(jnp.bfloat16)
    assert out_b.shape == origin_b.shape
    assert jnp.allclose(
        out_b.astype(jnp.float32), ref_b.astype(jnp.float32), atol=1e-2, rtol=1e-2
    )

    print("KERNEL_OK")
</pallas_src>

<mosaic_0001>
module attributes {stable_mosaic.version = 11 : i64} {
  func.func @_madc_kernel(%arg0: i32, %arg1: memref<1xf32, #tpu.memory_space<smem>>, %arg2: memref<8x128xf32, #tpu.memory_space<vmem>>, %arg3: memref<8x128xf32, #tpu.memory_space<vmem>>, %arg4: memref<8x128xf32, #tpu.memory_space<vmem>>) attributes {dimension_semantics = [#tpu.dimension_semantics<parallel>], iteration_bounds = array<i64: 2>, scalar_prefetch = 0 : i64, scratch_operands = 0 : i64, tpu.core_type = #tpu.core_type<tc>, window_params = [{transform_indices = @transform_0, window_bounds = array<i64: 1>}, {transform_indices = @transform_1, window_bounds = array<i64: 8, 128>}, {transform_indices = @transform_2, window_bounds = array<i64: 8, 128>}, {transform_indices = @transform_3, window_bounds = array<i64: 8, 128>}]} {
    %c0 = arith.constant 0 : index
    %0 = memref.load %arg1[%c0] : memref<1xf32, #tpu.memory_space<smem>>
    %c0_0 = arith.constant 0 : index
    %c0_1 = arith.constant 0 : index
    %1 = vector.load %arg3[%c0_0, %c0_1] : memref<8x128xf32, #tpu.memory_space<vmem>>, vector<8x128xf32>
    %2 = vector.broadcast %0 : f32 to vector<8x128xf32>
    %3 = arith.mulf %1, %2 : vector<8x128xf32>
    %c0_2 = arith.constant 0 : index
    %c0_3 = arith.constant 0 : index
    %4 = vector.load %arg2[%c0_2, %c0_3] : memref<8x128xf32, #tpu.memory_space<vmem>>, vector<8x128xf32>
    %5 = arith.addf %3, %4 : vector<8x128xf32>
    %c0_4 = arith.constant 0 : index
    %c0_5 = arith.constant 0 : index
    %6 = vector.load %arg4[%c0_4, %c0_5] : memref<8x128xf32, #tpu.memory_space<vmem>>, vector<8x128xf32>
    tpu.vector_store %arg4[%c0_4, %c0_5], %5 {strides = array<i32>} : memref<8x128xf32, #tpu.memory_space<vmem>>, vector<8x128xf32>,
    return
  }
  func.func @transform_0(%arg0: i32) -> i32 {
    %c0_i32 = arith.constant 0 : i32
    %c0_i32_0 = arith.constant 0 : i32
    return %c0_i32 : i32
  }
  func.func @transform_1(%arg0: i32) -> (i32, i32) {
    %c0_i32 = arith.constant 0 : i32
    %c0_i32_0 = arith.constant 0 : i32
    return %arg0, %c0_i32 : i32, i32
  }
  func.func @transform_2(%arg0: i32) -> (i32, i32) {
    %c0_i32 = arith.constant 0 : i32
    %c0_i32_0 = arith.constant 0 : i32
    return %arg0, %c0_i32 : i32, i32
  }
  func.func @transform_3(%arg0: i32) -> (i32, i32) {
    %c0_i32 = arith.constant 0 : i32
    %c0_i32_0 = arith.constant 0 : i32
    return %arg0, %c0_i32 : i32, i32
  }
}

</mosaic_0001>

<bundles_post_ra>
// kernel: tpu_custom_call.1
= control target key start
LH: loop header
LB: loop body
LE: loop exit
PB: predicated region body
PF: predicated region fallthrough
CT: control target
= control target key end

     0   :  { %s771_s0 = inlined_call_operand.<no memory space> [shape: f32[1], index: 0, kind: input, shape index: {}]   ;;  %s772_s1 = inlined_call_operand.hbm [shape: f32[16,128], index: 1, kind: input, shape index: {}]   ;;  %s773_s2 = inlined_call_operand.hbm [shape: f32[16,128], index: 2, kind: input, shape index: {}]   ;;  %s774_s3 = inlined_call_operand.hbm [shape: f32[16,128], index: 3, kind: output, shape index: {}]  }
   0x1   :  { %8 = sst [smem:[#allocation2]] %s771_s0 }
   0x2   :  { %9 = vsyncpa [#allocation4], 0 }
   0x3   :  { %11 = vsyncpa [#allocation4 + $0x1], 0 }
   0x4   :  { %12 = vsyncpa [#allocation7], 0 }
   0x5   :  { %14 = vsyncpa [#allocation7 + $0x1], 0 }
   0x6   :  { %15 = vsyncpa [#allocation5], 0 }
   0x7   :  { %17 = vsyncpa [#allocation5 + $0x1], 0  ;;  %s562_s14 = smov 0   ;;  %s564_s15 = smov 0  }
   0x8   :  { %s566_s16 = smov 0   ;;  %s568_s17 = smov 0  }
   0x9 LB: > { %s583_s0 = sadd.s32 4294967295, %s534_s17   ;;  %s338_s18 = sadd.s32 4294967294, %s534_s17   ;;  %s534_s17 = sphi %s568_s17, %s793_s17   ;;  %s530_s16 = sphi %s566_s16, %s792_s16   ;;  %s526_s15 = sphi %s564_s15, %s791_s15   ;;  %s522_s14 = sphi %s562_s14, %s790_s14  }
   0xa   : > { %s587_s19 = sadd.s32 1, %s534_s17   ;;  %s51_s20 = sadd.s32 1, %s530_s16 }
   0xb   : > { %s48_s21 = ssub.s32 %s534_s17, %s587_s19  ;;  %p58_p0 = scmp.ne.s32.totalorder %s530_s16, %s526_s15 }
   0xc   : > { %p49_p1 = scmp.eq.s32.totalorder %s48_s21, 0  ;;  %p59_p2 = scmp.eq.s32.totalorder %s534_s17, 0 }
   0xd   : > { %p64_p3 = scmp.ne.s32.totalorder %s526_s15, %s522_s14  ;;  %p65_p4 = scmp.eq.s32.totalorder %s583_s0, 0 }
   0xe   : > { %s599_s22 = scalar_select %p49_p1, %s530_s16, %s51_s20  }
   0xf   : > { %p601_p5 = por %p59_p2, %p58_p0  ;;  %p605_p6 = por %p65_p4, %p64_p3 }
  0x10   : > { %p114_p7 = scmp.eq.s32.totalorder %s583_s0, 1  ;;  %p120_p8 = scmp.eq.s32.totalorder %s338_s18, 1 }
  0x11   : > { %s778_s24 = scalar_select %p605_p6, 1, 0 }
  0x12   : > { %p370_p10 = scmp.lt.s32.totalorder %s534_s17, 2  ;;  %p612_p11 = por %p114_p7, %p58_p0 }
  0x13   : > { %p616_p12 = por %p120_p8, %p64_p3  ;;  %s621_s27 = sand.u32 1, %s530_s16  }
  0x14   : > { %s779_s25 = scalar_select %p612_p11, 1, 0 }
  0x15   : > { %s780_s26 = scalar_select %p616_p12, 1, 0 }
  0x16   : > { %s342_s28 = sshll.u32 %s534_s17, 7  ;;  %s341_s29 = sshll.u32 %s621_s27, 3 }
  0x17   : > { %s630_s5 = scalar_lea.hbm %s772_s1, %s342_s28  ;;  %s147_s6 = scalar_lea.vmem [#allocation3], %s341_s29 }
  0x18   : > { %s154_s7 = sshll.u32 %s147_s6, 4  ;;  %p636_p13 = pnand %p370_p10, %p601_p5  ;;  %s640_s7 = int_to_ptr.vmem [resolvable:$true] %s154_s7 }
  0x19   : > { %s144_s9 = scalar_lea.sflag [#allocation4], %s621_s27  ;;  %s404_s10 = scalar_lea.hbm %s630_s5, 128 }
  0x1a   : > { %p405_p2 = scmp.ne.s32.totalorder %s630_s5, %s404_s10  ;;  %p406_p3 = pneg %p636_p13 }
  0x1b   : > { %s409_s13 = scalar_lea.hbm %s772_s1, 256  ;;  %p410_p5 = scmp.lt.u32.totalorder %s630_s5, %s772_s1 }
  0x1c   : > { %p407_p4 = pnand %p406_p3, %p405_p2  ;;  %p411_p8 = scmp.lt.u32.totalorder %s409_s13, %s404_s10 }
  0x1d   : > { %p413_p9 = scmp.lt.u32.totalorder %s404_s10, %s630_s5 }
  0x1e   : > { %p408_p7 = pneg %p407_p4  ;;  %p412_p10 = por %p411_p8, %p410_p5 }
  0x20   : > { %p414_p0 = por %p413_p9, %p412_p10 }
  0x22   : > { %p415_p1 = pnand %p414_p0, %p408_p7 }
  0x24   : > { %418 = shalt.err (!%p415_p1)
}
  0x25   : > { %s419_s21 = scalar_lea.vmem %s640_s7, 128  ;;  %s536_s23 = smov [#allocation3]  }
  0x26   : > { %p420_p2 = scmp.ne.s32.totalorder %s640_s7, %s419_s21  ;;  %s424_s30 = sshll.u32 %s536_s23, 4  ;;  %s425_s30 = int_to_ptr.vmem [resolvable:$false] %s424_s30 }
  0x27   : > { %s426_s4 = scalar_lea.vmem %s425_s30, 256  ;;  %p427_p11 = scmp.lt.s32.totalorder %s640_s7, %s425_s30 }
  0x28   : > { %p422_p4 = pnand %p420_p2, %p406_p3  ;;  %p428_p5 = scmp.lt.s32.totalorder %s426_s4, %s419_s21 }
  0x2a   : > { %p423_p12 = pneg %p422_p4  ;;  %p429_p8 = por %p428_p5, %p427_p11 }
  0x2c   : > { %p430_p9 = pnand %p429_p8, %p423_p12 }
  0x2e   : > { %433 = shalt.err (!%p430_p9)
}
  0x2f   : > { %362 = dma.hbm_to_vmem [thread:$0]  (!%p636_p13), %s630_s5, 128, %s640_s7, %s144_s9  }
  0x30   : > { %p782_p0 = scmp.lt.s32.totalorder %s534_s17, 3  ;;  %p783_p1 = scmp.ge.s32.totalorder %s534_s17, 1 }
  0x31   : > { %s683_s12 = scalar_lea.hbm %s773_s2, %s342_s28  ;;  %s165_s13 = scalar_lea.vmem [#allocation6], %s341_s29 }
  0x32   : > { %p674_p7 = pnand %p783_p1, %p782_p0  ;;  %s172_s18 = sshll.u32 %s165_s13, 4  ;;  %s173_s18 = int_to_ptr.vmem [resolvable:$true] %s172_s18 }
  0x33   : > { %s162_s5 = scalar_lea.sflag [#allocation7], %s621_s27  ;;  %s434_s7 = scalar_lea.hbm %s683_s12, 128 }
  0x34   : > { %s784_s6 = scalar_select %p674_p7, 1, 0 }
  0x35   : > { %p435_p11 = scmp.ne.s32.totalorder %s683_s12, %s434_s7  ;;  %s439_s28 = scalar_lea.hbm %s773_s2, 256 }
  0x36   : > { %p440_p2 = scmp.lt.u32.totalorder %s683_s12, %s773_s2  ;;  %p441_p4 = scmp.lt.u32.totalorder %s439_s28, %s434_s7 }
  0x37   : > { %p437_p12 = pnand %p435_p11, %p406_p3  ;;  %p443_p8 = scmp.lt.u32.totalorder %s434_s7, %s683_s12 }
  0x38   : > { %p442_p5 = por %p441_p4, %p440_p2 }
  0x39   : > { %p438_p10 = pneg %p437_p12 }
  0x3a   : > { %p444_p9 = por %p443_p8, %p442_p5 }
  0x3c   : > { %p445_p0 = pnand %p444_p9, %p438_p10 }
  0x3e   : > { %448 = shalt.err (!%p445_p0)
}
  0x3f   : > { %s449_s27 = scalar_lea.vmem %s173_s18, 128  ;;  %s537_s29 = smov [#allocation6]  }
  0x40   : > { %p450_p1 = scmp.ne.s32.totalorder %s173_s18, %s449_s27  ;;  %s454_s30 = sshll.u32 %s537_s29, 4  ;;  %s455_s30 = int_to_ptr.vmem [resolvable:$false] %s454_s30 }
  0x41   : > { %s456_s4 = scalar_lea.vmem %s455_s30, 256  ;;  %p457_p6 = scmp.lt.s32.totalorder %s173_s18, %s455_s30 }
  0x42   : > { %p452_p11 = pnand %p450_p1, %p406_p3  ;;  %p458_p7 = scmp.lt.s32.totalorder %s456_s4, %s449_s27 }
  0x44   : > { %p453_p12 = pneg %p452_p11  ;;  %p459_p2 = por %p458_p7, %p457_p6 }
  0x46   : > { %p460_p4 = pnand %p459_p2, %p453_p12 }
  0x48   : > { %463 = shalt.err (!%p460_p4)
}
  0x49   : > { %365 = dma.hbm_to_vmem [thread:$0]  (!%p636_p13), %s683_s12, 128, %s173_s18, %s162_s5  }
  0x4a   : > { %p785_p10 = scmp.ne.s32.totalorder %s784_s6, 0 }
  0x4b   : > { %s710_s10 = sand.u32 (!%p785_p10), 1, %s526_s15   ;;  %p786_p3 = scmp.ne.s32.totalorder (!%p785_p10), %s778_s24, 0 }
  0x4c   : > { %181 = sbr.rel (%p785_p10) target bundleno = 112 (0x70), region = 32  ;;  %s346_s11 = sshll.u32 (!%p785_p10), %s710_s10, 3 }
  0x4d   : > { %s184_s13 = scalar_lea.sflag (!%p785_p10), [#allocation4], %s710_s10  ;;  %s187_s7 = scalar_lea.vmem (!%p785_p10), [#allocation3], %s346_s11 }
  0x53   : > { %509 = dma.done.wait (%p786_p3), %s184_s13, 128  }
  0x54   : > { %511 = vsyncadd (%p786_p3), %s184_s13, 4294967168  ;;  %s193_s8 = scalar_lea.sflag [#allocation7], %s710_s10  ;;  %s196_s12 = scalar_lea.vmem [#allocation6], %s346_s11 }
  0x55   : > { %513 = dma.done.wait (%p786_p3), %s193_s8, 128  }
  0x56   : > { %515 = vsyncadd (%p786_p3), %s193_s8, 4294967168  ;;  %s224_s6 = sld [smem:[#allocation2]]  ;;  %v225_v0 = vld [vmem:[%s196_s12] sm:$0xff]  ;;  %v228_v2 = vld [vmem:[%s187_s7] sm:$0xff]  ;;  %s223_s18 = scalar_lea.vmem [#allocation8], %s346_s11 }
  0x57   : > { %s245_s5 = sshll.u32 %s223_s18, 4  ;;  %s350_s9 = sshll.u32 %s583_s0, 7  ;;  %s724_s5 = int_to_ptr.vmem [resolvable:$true] %s245_s5 }
  0x58   : > { %s729_s24 = scalar_lea.hbm %s774_s3, %s350_s9  ;;  %s232_s21 = scalar_lea.sflag [#allocation5], %s710_s10 }
  0x59   : > { %s464_s23 = scalar_lea.vmem %s724_s5, 128  ;;  %p787_p13 = scmp.ne.s32.totalorder %s779_s25, 0 }
  0x5a   : > { %p465_p6 = scmp.ne.s32.totalorder %s724_s5, %s464_s23  ;;  %s538_s0 = smov [#allocation8]  }
  0x5b   : > { %s468_s27 = sshll.u32 %s538_s0, 4  ;;  %s469_s27 = int_to_ptr.vmem [resolvable:$false] %s468_s27 }
  0x5c   : > { %v226_v1 = vstv %s224_s6  ;;  %p466_p7 = pnand %p465_p6, %p787_p13  ;;  %s470_s29 = scalar_lea.vmem %s469_s27, 256 }
  0x5d   : > { %v227_v3 = vmul.f32 %v226_v1, %v225_v0  ;;  %p471_p8 = scmp.lt.s32.totalorder %s724_s5, %s469_s27  ;;  %p472_p9 = scmp.lt.s32.totalorder %s470_s29, %s464_s23 }
  0x5e   : > { %p467_p5 = pneg %p466_p7 }
  0x5f   : > { %v229_v4 = vadd.f32 %v228_v2, %v227_v3  ;;  %p473_p0 = por %p472_p9, %p471_p8 }
  0x61   : > { %230 = vst [vmem:[%s223_s18] sm:$0xff] %v229_v4  ;;  %p474_p1 = pnand %p473_p0, %p467_p5 }
  0x63   : > { %477 = shalt.err (!%p474_p1)
}
  0x64   : > { %s478_s30 = scalar_lea.hbm %s729_s24, 128  ;;  %s482_s11 = scalar_lea.hbm %s774_s3, 256 }
  0x65   : > { %p479_p11 = scmp.ne.s32.totalorder %s729_s24, %s478_s30  ;;  %p483_p4 = scmp.lt.u32.totalorder %s729_s24, %s774_s3 }
  0x66   : > { %p484_p10 = scmp.lt.u32.totalorder %s482_s11, %s478_s30  ;;  %p486_p6 = scmp.lt.u32.totalorder %s478_s30, %s729_s24 }
  0x67   : > { %p480_p12 = pnand %p479_p11, %p787_p13 }
  0x68   : > { %p485_p3 = por %p484_p10, %p483_p4 }
  0x69   : > { %p481_p2 = pneg %p480_p12 }
  0x6a   : > { %p487_p7 = por %p486_p6, %p485_p3 }
  0x6c   : > { %p488_p5 = pnand %p487_p7, %p481_p2 }
  0x6e   : > { %491 = shalt.err (!%p488_p5)
}
  0x6f   : > { %357 = dma.vmem_to_hbm [thread:$0]  (%p787_p13), %s724_s5, 128, %s729_s24, %s232_s21  }
  0x70 PF: > { %s257_s8 = sand.u32 1, %s522_s14   ;;  %p788_p8 = scmp.ne.s32.totalorder %s780_s26, 0 }
  0x71   : > { %p789_p9 = scmp.ge.s32.totalorder %s534_s17, 2  ;;  %s258_s12 = scalar_lea.sflag [#allocation5], %s257_s8 }
  0x73   : > { %p367_p0 = pnand %p789_p9, %p788_p8 }
  0x75   : > { %517 = dma.done.wait (!%p367_p0), %s258_s12, 128  }
  0x76   : > { %519 = vsyncadd (!%p367_p0), %s258_s12, 4294967168  ;;  %p20_p1 = scmp.ge.s32.totalorder %s587_s19, 4   ;;  %s790_s14 = smov %s526_s15 }
  0x77   : > { %s791_s15 = smov %s530_s16  ;;  %s792_s16 = smov %s599_s22 }
  0x78   : > { %s793_s17 = smov %s587_s19  ;;  %22 = sbr.rel (!%p20_p1) target bundleno = 9 (0x9), region = 90 }
  0x7f   :  { %263 = vsyncpa [#allocation4], 1 }
  0x80   :  { %265 = vsyncpa [#allocation4 + $0x1], 1 }
  0x81   :  { %266 = vsyncpa [#allocation7], 1 }
  0x82   :  { %268 = vsyncpa [#allocation7 + $0x1], 1 }
  0x83   :  { %269 = vsyncpa [#allocation5], 1 }
  0x84   :  { %271 = vsyncpa [#allocation5 + $0x1], 1 }

</bundles_post_ra>
